<compile_context>
chip_gen: v6e
topology: v6e:2x2x1
jax: 0.10.0
libtpu: 0.0.40
codegen_flags: <defaults>
</compile_context>

<pallas_src>
import functools

import jax
import jax.numpy as jnp
from jax.experimental import pallas as pl
from jax.experimental.pallas import tpu as pltpu


def _round_up(x, m):
    return ((x + m - 1) // m) * m


def _pick_tiles():
    """Per-generation (tm, tn, tk) maxima, sized to the scoped-VMEM budget."""
    kind = jax.devices()[0].device_kind.lower()
    if "v5" in kind:
        # v5e: 512^3 -> ~4-5 MiB double-buffered, inside the 16 MiB default.
        return 512, 512, 512
    # v6e / v7x: 1024x1024x512 -> ~12 MiB double-buffered (x/w bf16 + f32 out),
    # inside the 32 MiB scoped default and v7x's 64 MiB physical VMEM.
    return 1024, 1024, 512


def _dense_tanh_kernel(x_ref, w_ref, b_ref, o_ref):
    # x_ref: (tm, tk) bf16   w_ref: (tk, tn) bf16
    # b_ref: (1, tn)  f32    o_ref: (tm, tn) f32 -- doubles as the accumulator
    # (output block index is independent of k, so it stays VMEM-resident).
    k = pl.program_id(2)

    @pl.when(k == 0)
    def _():
        o_ref[...] = jnp.zeros_like(o_ref)

    o_ref[...] += jnp.dot(
        x_ref[...], w_ref[...], preferred_element_type=jnp.float32
    )

    @pl.when(k == pl.num_programs(2) - 1)
    def _():
        # Epilogue: bias add (VPU) + tanh (EUP) in place, once per output tile.
        o_ref[...] = jnp.tanh(o_ref[...] + b_ref[...])


# Below ~2*512^3 flops the kernel-launch + cast overhead dominates; let XLA fuse.
_SMALL_PROBLEM_FLOPS = 2 * (512 ** 3)


def dense_tanh(x2d, w, b, *, force_pallas=False):
    """x2d: (M, K), w: (K, N) (f32 or bf16), b: (N,) -> (M, N) f32.

    bf16 MXU inputs, f32 accumulation directly in the output tile.
    """
    M, K = x2d.shape
    Kw, N = w.shape
    assert K == Kw and b.shape == (N,)

    x_bf = x2d.astype(jnp.bfloat16)
    w_bf = w if w.dtype == jnp.bfloat16 else w.astype(jnp.bfloat16)
    b_f32 = b.astype(jnp.float32)

    if (not force_pallas) and (2 * M * N * K < _SMALL_PROBLEM_FLOPS):
        # Tiny-shape fast path: a single fused XLA op beats pad/launch overhead.
        return jnp.tanh(
            jnp.dot(x_bf, w_bf, preferred_element_type=jnp.float32) + b_f32
        )

    tm_max, tn_max, tk_max = _pick_tiles()

    # Only the K (reduction) axis needs zero padding.
    Kp = _round_up(K, 128)
    if Kp != K:
        x_bf = jnp.pad(x_bf, ((0, 0), (0, Kp - K)))
        w_bf = jnp.pad(w_bf, ((0, Kp - K), (0, 0)))

    # tk must divide Kp exactly (masked edge blocks are not allowed on the
    # reduction axis); Kp is a multiple of 128 so tk=128 always terminates.
    tk = min(tk_max, Kp)
    while Kp % tk != 0:
        tk -= 128

    # M/N edge blocks are masked by Pallas; tiles only need (8, 128) alignment.
    tm = min(tm_max, _round_up(M, 8))
    tn = min(tn_max, _round_up(N, 128))

    b2d = b_f32.reshape(1, N)
    grid = (pl.cdiv(M, tm), pl.cdiv(N, tn), Kp // tk)

    cost = pl.CostEstimate(
        flops=2 * M * N * Kp,
        transcendentals=M * N,
        bytes_accessed=(M * Kp * 2 + Kp * N * 2 + N * 4 + M * N * 4),
    )

    return pl.pallas_call(
        _dense_tanh_kernel,
        out_shape=jax.ShapeDtypeStruct((M, N), jnp.float32),
        grid_spec=pltpu.PrefetchScalarGridSpec(
            num_scalar_prefetch=0,
            grid=grid,
            in_specs=[
                pl.BlockSpec((tm, tk), lambda i, j, k: (i, k)),
                pl.BlockSpec((tk, tn), lambda i, j, k: (k, j)),
                pl.BlockSpec((1, tn), lambda i, j, k: (0, j)),
            ],
            out_specs=pl.BlockSpec((tm, tn), lambda i, j, k: (i, j)),
        ),
        compiler_params=pltpu.CompilerParams(
            dimension_semantics=("parallel", "parallel", "arbitrary"),
        ),
        cost_estimate=cost,
    )(x_bf, w_bf, b2d)


def inner_module(text, w, b, *, force_pallas=False):
    """The wrapped `module`: returns a tuple, like an HF encoder."""
    B, S, H = text.shape
    h2d = dense_tanh(text.reshape(B * S, H), w, b, force_pallas=force_pallas)
    h = h2d.reshape(B, S, -1)
    return (h,)


def dummy_module_forward(text, w, b, dummy_tensor=None, *, force_pallas=False):
    """DummyModule.forward: call wrapped module, return ret[0]."""
    ret = inner_module(text, w, b, force_pallas=force_pallas)
    return ret[0]


if __name__ == "__main__":
    B, S, H = 2, 8, 128
    key = jax.random.PRNGKey(0)
    k_x, k_w, k_b = jax.random.split(key, 3)

    text = jax.random.normal(k_x, (B, S, H), dtype=jnp.float32)
    # Deterministic synthetic parameters for the wrapped module (H -> H dense).
    w = jax.random.normal(k_w, (H, H), dtype=jnp.float32) * 0.02
    b = jax.random.normal(k_b, (H,), dtype=jnp.float32) * 0.01

    # Cast the weight to bf16 once (parameter), outside the per-call path.
    w_bf = w.astype(jnp.bfloat16)

    # Force the Pallas path so the kernel itself is exercised at demo size
    # (the fast path would otherwise take over for such a tiny problem).
    fwd = jax.jit(functools.partial(dummy_module_forward, force_pallas=True))
    out = jax.block_until_ready(fwd(text, w_bf, b))

    # Reference: same bf16-input / f32-accumulate math in plain JAX.
    ref = jnp.tanh(
        jnp.dot(
            text.reshape(B * S, H).astype(jnp.bfloat16),
            w_bf,
            preferred_element_type=jnp.float32,
        )
        + b
    ).reshape(B, S, H)

    assert out.shape == (B, S, H)
    assert jnp.allclose(out, ref, atol=5e-3, rtol=5e-3)
    print("KERNEL_OK")
</pallas_src>

<mosaic_0001>
module attributes {stable_mosaic.version = 11 : i64} {
  func.func @_dense_tanh_kernel(%arg0: i32, %arg1: i32, %arg2: i32, %arg3: memref<16x128xbf16, #tpu.memory_space<vmem>>, %arg4: memref<128x128xbf16, #tpu.memory_space<vmem>>, %arg5: memref<1x128xf32, #tpu.memory_space<vmem>>, %arg6: memref<16x128xf32, #tpu.memory_space<vmem>>) attributes {dimension_semantics = [#tpu.dimension_semantics<parallel>, #tpu.dimension_semantics<parallel>, #tpu.dimension_semantics<arbitrary>], iteration_bounds = array<i64: 1, 1, 1>, scalar_prefetch = 0 : i64, scratch_operands = 0 : i64, tpu.core_type = #tpu.core_type<tc>, window_params = [{transform_indices = @transform_0, window_bounds = array<i64: 16, 128>}, {transform_indices = @transform_1, window_bounds = array<i64: 128, 128>}, {transform_indices = @transform_2, window_bounds = array<i64: 1, 128>}, {transform_indices = @transform_3, window_bounds = array<i64: 16, 128>}]} {
    %c0_i32 = arith.constant 0 : i32
    %0 = arith.cmpi eq, %arg2, %c0_i32 : i32
    %1 = arith.extui %0 : i1 to i32
    %c0_i32_0 = arith.constant 0 : i32
    %2 = arith.cmpi ne, %1, %c0_i32_0 : i32
    scf.if %2 {
      %cst_10 = arith.constant 0.000000e+00 : f32
      %12 = vector.broadcast %cst_10 : f32 to vector<16x128xf32>
      %c0_11 = arith.constant 0 : index
      %c0_12 = arith.constant 0 : index
      %13 = vector.load %arg6[%c0_11, %c0_12] : memref<16x128xf32, #tpu.memory_space<vmem>>, vector<16x128xf32>
      tpu.vector_store %arg6[%c0_11, %c0_12], %12 {strides = array<i32>} : memref<16x128xf32, #tpu.memory_space<vmem>>, vector<16x128xf32>,
    } else {
    }
    %c0 = arith.constant 0 : index
    %c0_1 = arith.constant 0 : index
    %3 = vector.load %arg6[%c0, %c0_1] : memref<16x128xf32, #tpu.memory_space<vmem>>, vector<16x128xf32>
    %c0_2 = arith.constant 0 : index
    %c0_3 = arith.constant 0 : index
    %4 = vector.load %arg3[%c0_2, %c0_3] : memref<16x128xbf16, #tpu.memory_space<vmem>>, vector<16x128xbf16>
    %c0_4 = arith.constant 0 : index
    %c0_5 = arith.constant 0 : index
    %5 = vector.load %arg4[%c0_4, %c0_5] : memref<128x128xbf16, #tpu.memory_space<vmem>>, vector<128x128xbf16>
    %cst = arith.constant dense<0.000000e+00> : vector<16x128xf32>
    %6 = tpu.matmul %4, %5, %cst {dimension_numbers = #tpu.dot_dimension_numbers<[1], [0], [0], [1], [0, 0, 1, 1], [], []>} : vector<16x128xbf16>, vector<128x128xbf16>, vector<16x128xf32> -> vector<16x128xf32>
    %7 = arith.addf %3, %6 : vector<16x128xf32>
    %c0_6 = arith.constant 0 : index
    %c0_7 = arith.constant 0 : index
    %8 = vector.load %arg6[%c0_6, %c0_7] : memref<16x128xf32, #tpu.memory_space<vmem>>, vector<16x128xf32>
    tpu.vector_store %arg6[%c0_6, %c0_7], %7 {strides = array<i32>} : memref<16x128xf32, #tpu.memory_space<vmem>>, vector<16x128xf32>,
    %c0_i32_8 = arith.constant 0 : i32
    %9 = arith.cmpi eq, %arg2, %c0_i32_8 : i32
    %10 = arith.extui %9 : i1 to i32
    %c0_i32_9 = arith.constant 0 : i32
    %11 = arith.cmpi ne, %10, %c0_i32_9 : i32
    scf.if %11 {
      %c0_10 = arith.constant 0 : index
      %c0_11 = arith.constant 0 : index
      %12 = vector.load %arg6[%c0_10, %c0_11] : memref<16x128xf32, #tpu.memory_space<vmem>>, vector<16x128xf32>
      %c0_12 = arith.constant 0 : index
      %c0_13 = arith.constant 0 : index
      %13 = vector.load %arg5[%c0_12, %c0_13] : memref<1x128xf32, #tpu.memory_space<vmem>>, vector<1x128xf32>
      %14 = vector.broadcast %13 : vector<1x128xf32> to vector<16x128xf32>
      %15 = arith.addf %12, %14 : vector<16x128xf32>
      %16 = math.tanh %15 : vector<16x128xf32>
      %c0_14 = arith.constant 0 : index
      %c0_15 = arith.constant 0 : index
      %17 = vector.load %arg6[%c0_14, %c0_15] : memref<16x128xf32, #tpu.memory_space<vmem>>, vector<16x128xf32>
      tpu.vector_store %arg6[%c0_14, %c0_15], %16 {strides = array<i32>} : memref<16x128xf32, #tpu.memory_space<vmem>>, vector<16x128xf32>,
    } else {
    }
    return
  }
  func.func @transform_0(%arg0: i32, %arg1: i32, %arg2: i32) -> (i32, i32) {
    %c0_i32 = arith.constant 0 : i32
    return %arg0, %arg2 : i32, i32
  }
  func.func @transform_1(%arg0: i32, %arg1: i32, %arg2: i32) -> (i32, i32) {
    %c0_i32 = arith.constant 0 : i32
    return %arg2, %arg1 : i32, i32
  }
  func.func @transform_2(%arg0: i32, %arg1: i32, %arg2: i32) -> (i32, i32) {
    %c0_i32 = arith.constant 0 : i32
    %c0_i32_0 = arith.constant 0 : i32
    return %c0_i32, %arg1 : i32, i32
  }
  func.func @transform_3(%arg0: i32, %arg1: i32, %arg2: i32) -> (i32, i32) {
    %c0_i32 = arith.constant 0 : i32
    return %arg0, %arg1 : i32, i32
  }
}

</mosaic_0001>

<bundles_post_ra>
// kernel: dummy_module_forward.1
= control target key start
LH: loop header
LB: loop body
LE: loop exit
PB: predicated region body
PF: predicated region fallthrough
CT: control target
= control target key end

     0   :  { %8 = vsyncpa [#allocation3], 0  ;;  %s334_s0 = inlined_call_operand.vmem [shape: bf16[16,128], index: 0, kind: input, shape index: {}]   ;;  %s335_s1 = inlined_call_operand.hbm [shape: bf16[128,128], index: 1, kind: input, shape index: {}]   ;;  %s336_s2 = inlined_call_operand.vmem [shape: f32[1,128], index: 2, kind: input, shape index: {}]   ;;  %s337_s3 = inlined_call_operand.hbm [shape: f32[16,128], index: 3, kind: output, shape index: {}]  }
   0x1   :  { %9 = vsyncpa [#allocation4], 0  ;;  %s294_s12 = smov [#allocation2]  }
   0x2   :  { %s17_s13 = sshll.u32 %s294_s12, 4  ;;  %s18_s13 = int_to_ptr.vmem [resolvable:$true] %s17_s13 }
   0x3   :  { %s258_s14 = scalar_lea.vmem %s18_s13, 1024  ;;  %p263_p1 = scmp.lt.s32.totalorder %s18_s13, %s18_s13 }
   0x4   :  { %p259_p0 = scmp.ne.s32.totalorder %s18_s13, %s258_s14  ;;  %p264_p2 = scmp.lt.s32.totalorder %s258_s14, %s258_s14 }
   0x6   :  { %p265_p3 = por %p264_p2, %p263_p1 }
   0x8   :  { %p266_p4 = pnand %p265_p3, %p259_p0 }
   0xa   :  { %269 = shalt.err (!%p266_p4)
}
   0xb   :  { %s295_s15 = smov 64   ;;  %s296_s16 = smov 4  }
   0xc   :  { %23 = dma.hbm_to_vmem [thread:$0]  %s335_s1, 1024, %s18_s13, [#allocation3], %s295_s15, %s295_s15, %s296_s16  }
   0xd   :  { %290 = dma.done.wait [#allocation3], 1024  }
   0xe   :  { %291 = vsyncadd [#allocation3], 4294966272  ;;  %v297_v0 = vmov 0.0   ;;  %vm298_vm0 = vmmov 0   ;;  %v237_v1 = vld [vmem:[#allocation2 + $0x38] sm:$0xff]   ;;  %v238_v2 = vld [vmem:[#allocation2 + $0x30] sm:$0xff]  }
   0xf   :  { %209 = vmatprep.subr.bf16.mxu0 %v297_v0  ;;  %225 = vmatprep.mubr.msk.bf16.mxu0 %vm298_vm0, %v297_v0  ;;  %v239_v3 = vld [vmem:[#allocation2 + $0x28] sm:$0xff]   ;;  %v240_v4 = vld [vmem:[#allocation2 + $0x20] sm:$0xff]   ;;  %v241_v5 = vld [vmem:[#allocation2 + $0x18] sm:$0xff]   ;;  %s299_s22 = smov [#allocation5]  }
  0x10   :  { %210 = vmatpush3.bf16.msra.mxu0 %v237_v1  ;;  %v242_v6 = vld [vmem:[#allocation2 + $0x10] sm:$0xff]   ;;  %v243_v7 = vld [vmem:[#allocation2 + $0x8] sm:$0xff]   ;;  %v244_v8 = vld [vmem:[#allocation2] sm:$0xff]   ;;  %s178_s23 = sshll.u32 %s299_s22, 4  ;;  %s179_s23 = int_to_ptr.vmem [resolvable:$true] %s178_s23 }
  0x11   :  { %211 = vmatprep.subr.bf16.mxu0 %v297_v0  ;;  %v245_v9 = vld [vmem:[%s334_s0] sm:$0xff]   ;;  %s270_s0 = scalar_lea.vmem %s179_s23, 256  ;;  %p275_p6 = scmp.lt.s32.totalorder %s179_s23, %s179_s23 }
  0x12   :  { %v199_v11 = vld [vmem:[%s336_s2] ss:$0 sm:$0xff]  ;;  %p271_p5 = scmp.ne.s32.totalorder %s179_s23, %s270_s0  ;;  %p276_p7 = scmp.lt.s32.totalorder %s270_s0, %s270_s0 }
  0x14   :  { %212 = vmatpush3.bf16.msra.mxu0 %v238_v2  ;;  %p277_p8 = por %p276_p7, %p275_p6 }
  0x15   :  { %213 = vmatprep.subr.bf16.mxu0 %v297_v0 }
  0x16   :  { %p278_p9 = pnand %p277_p8, %p271_p5 }
  0x18   :  { %214 = vmatpush3.bf16.msra.mxu0 %v239_v3 }
  0x19   :  { %215 = vmatprep.subr.bf16.mxu0 %v297_v0 }
  0x1c   :  { %216 = vmatpush3.bf16.msra.mxu0 %v240_v4 }
  0x1d   :  { %217 = vmatprep.subr.bf16.mxu0 %v297_v0 }
  0x20   :  { %218 = vmatpush3.bf16.msra.mxu0 %v241_v5 }
  0x21   :  { %219 = vmatprep.subr.bf16.mxu0 %v297_v0 }
  0x24   :  { %220 = vmatpush3.bf16.msra.mxu0 %v242_v6 }
  0x25   :  { %221 = vmatprep.subr.bf16.mxu0 %v297_v0 }
  0x28   :  { %222 = vmatpush3.bf16.msra.mxu0 %v243_v7 }
  0x29   :  { %223 = vmatprep.subr.bf16.mxu0 %v297_v0 }
  0x2c   :  { %224 = vmatpush3.bf16.msra.mxu0 %v244_v8 }
  0x2f   :  { %226 = vmatmul.mubr.bf16.vlgmr.msra.gmra.mxu0 %v245_v9 }
  0xef   :  { %v144_v10 = vpop.f32.mrf.mxu0 }
  0xf0   :  { %v167_v13 = vadd.f32 %v199_v11, %v144_v10 }
  0xf1   :  { %v227_v12 = vpop.f32.mrf.mxu0 }
  0xf2   :  { %246 = vtanh.f32 %v167_v13 }
  0xf3   :  { %v147_v14 = vpop.f32.mrf.mxu0 }
  0xf4   :  { %v168_v16 = vadd.f32 %v199_v11, %v147_v14 }
  0xf5   :  { %v228_v15 = vpop.f32.mrf.mxu0 }
  0xf6   :  { %248 = vtanh.f32 %v168_v16 }
  0xff   :  { %v247_v17 = vpop.eup %246 }
 0x100   :  { %171 = vst [vmem:[#allocation5] sm:$0xff] %v247_v17 }
 0x103   :  { %v249_v18 = vpop.eup %248 }
 0x104   :  { %172 = vst [vmem:[#allocation5 + $0x8] sm:$0xff] %v249_v18 }
 0x105   :  { %281 = shalt.err (!%p278_p9)
}
 0x106   :  { %s300_s2 = smov 128   ;;  %s301_s24 = smov 8  }
 0x107   :  { %184 = dma.vmem_to_hbm [thread:$0]  %s179_s23, 256, %s337_s3, [#allocation4], %s300_s2, %s300_s2, %s301_s24  }
 0x108   :  { %292 = dma.done.wait [#allocation4], 256  }
 0x109   :  { %293 = vsyncadd [#allocation4], 4294967040 }
 0x10a   :  { %188 = vsyncpa [#allocation3], 1 }
 0x10b   :  { %189 = vsyncpa [#allocation4], 1 }

</bundles_post_ra>
